<compile_context>
chip_gen: v7x
topology: tpu7x:2x2x1
jax: 0.10.0
libtpu: 0.0.40
codegen_flags: <defaults>
</compile_context>

<pallas_src>
import functools

import jax
import jax.numpy as jnp
from jax.experimental import pallas as pl
from jax.experimental.pallas import tpu as pltpu

_LN_EPS = 1e-5  # torch.nn.LayerNorm default eps


# ------------------------------ fused kernel --------------------------------

def _seqnn_kernel(x_ref, w_ref, b_ref, o_ref, *, num_steps):
    """Fused SeqNN: num_steps x (Linear -> LayerNorm(no affine) -> ReLU).

    x_ref: (block_m, dim)         activation row-tile
    w_ref: (num_steps, dim, dim)  stacked weights, stored as W^T (in, out)
    b_ref: (num_steps, 1, dim)    stacked biases
    o_ref: (block_m, dim)
    """
    h = x_ref[...]
    for l in range(num_steps):          # static unroll — weights stay in VMEM
        w = w_ref[l]                    # (dim, dim)
        b = b_ref[l]                    # (1, dim) -> broadcast over rows
        h = jnp.dot(h, w, preferred_element_type=jnp.float32) + b
        # LayerNorm over the feature (lane) axis, elementwise_affine=False
        mean = jnp.mean(h, axis=-1, keepdims=True)
        var = jnp.mean(jnp.square(h - mean), axis=-1, keepdims=True)
        h = (h - mean) * jax.lax.rsqrt(var + _LN_EPS)
        # ReLU
        h = jnp.maximum(h, 0.0)
    o_ref[...] = h


# --------------------------------- wrapper ----------------------------------

@jax.jit
def seqnn_forward(params, pre_h):
    w = params["w"]                     # (num_steps, dim, dim)  == torch W^T per layer
    b = params["b"]                     # (num_steps, 1, dim)
    n, dim = pre_h.shape
    num_steps = w.shape[0]

    # Pick the largest row tile that divides N (so big N tiles cleanly and
    # gets sharded across TensorCores); small N falls back to a single block.
    block_m = n
    for cand in (512, 256, 128, 64, 32, 16, 8):
        if n % cand == 0:
            block_m = cand
            break
    grid = (n // block_m,)

    kernel = functools.partial(_seqnn_kernel, num_steps=num_steps)
    return pl.pallas_call(
        kernel,
        out_shape=jax.ShapeDtypeStruct((n, dim), jnp.float32),
        grid=grid,
        in_specs=[
            pl.BlockSpec((block_m, dim), lambda i: (i, 0)),
            pl.BlockSpec((num_steps, dim, dim), lambda i: (0, 0, 0)),
            pl.BlockSpec((num_steps, 1, dim), lambda i: (0, 0, 0)),
        ],
        out_specs=pl.BlockSpec((block_m, dim), lambda i: (i, 0)),
        compiler_params=pltpu.CompilerParams(
            dimension_semantics=("parallel",)),
    )(pre_h, w, b)


# ------------------------------ pure-JAX reference ---------------------------

def seqnn_ref(params, pre_h):
    h = pre_h
    for l in range(params["w"].shape[0]):
        h = h @ params["w"][l] + params["b"][l]
        mean = jnp.mean(h, axis=-1, keepdims=True)
        var = jnp.mean(jnp.square(h - mean), axis=-1, keepdims=True)
        h = (h - mean) * jax.lax.rsqrt(var + _LN_EPS)
        h = jnp.maximum(h, 0.0)
    return h


# ----------------------------------- main ------------------------------------

if __name__ == "__main__":
    num_steps = 4
    dim = 32
    N = 16

    root = jax.random.PRNGKey(0)
    kw, kb, kx = jax.random.split(root, 3)

    params = dict(
        w=jax.random.normal(kw, (num_steps, dim, dim), jnp.float32)
          * (1.0 / jnp.sqrt(dim)),
        b=jax.random.normal(kb, (num_steps, 1, dim), jnp.float32) * 0.01,
    )
    pre_h = jax.random.normal(kx, (N, dim), jnp.float32)

    post_h = jax.block_until_ready(seqnn_forward(params, pre_h))

    assert post_h.shape == (N, dim)
    assert not bool(jnp.isnan(post_h).any())
    ref = seqnn_ref(params, pre_h)
    assert bool(jnp.allclose(post_h, ref, atol=1e-5, rtol=1e-5)), "mismatch vs reference"

    print("KERNEL_OK")
</pallas_src>

<mosaic_0001>
module attributes {stable_mosaic.version = 11 : i64} {
  func.func @_seqnn_kernel(%arg0: i32, %arg1: memref<16x32xf32, #tpu.memory_space<vmem>>, %arg2: memref<4x32x32xf32, #tpu.memory_space<vmem>>, %arg3: memref<4x1x32xf32, #tpu.memory_space<vmem>>, %arg4: memref<16x32xf32, #tpu.memory_space<vmem>>) attributes {dimension_semantics = [#tpu.dimension_semantics<parallel>], iteration_bounds = array<i64: 1>, scalar_prefetch = 0 : i64, scratch_operands = 0 : i64, tpu.core_type = #tpu.core_type<tc>, window_params = [{transform_indices = @transform_0, window_bounds = array<i64: 16, 32>}, {pipeline_mode = #tpu.pipeline_mode<synchronous>, transform_indices = @transform_1, window_bounds = array<i64: 4, 32, 32>}, {pipeline_mode = #tpu.pipeline_mode<synchronous>, transform_indices = @transform_2, window_bounds = array<i64: 4, 1, 32>}, {transform_indices = @transform_3, window_bounds = array<i64: 16, 32>}]} {
    %c0 = arith.constant 0 : index
    %c0_0 = arith.constant 0 : index
    %0 = vector.load %arg1[%c0, %c0_0] : memref<16x32xf32, #tpu.memory_space<vmem>>, vector<16x32xf32>
    %c0_1 = arith.constant 0 : index
    %c0_2 = arith.constant 0 : index
    %c0_3 = arith.constant 0 : index
    %1 = vector.load %arg2[%c0_1, %c0_2, %c0_3] : memref<4x32x32xf32, #tpu.memory_space<vmem>>, vector<1x32x32xf32>
    %2 = vector.shape_cast %1 : vector<1x32x32xf32> to vector<32x32xf32>
    %c0_4 = arith.constant 0 : index
    %c0_5 = arith.constant 0 : index
    %c0_6 = arith.constant 0 : index
    %3 = vector.load %arg3[%c0_4, %c0_5, %c0_6] : memref<4x1x32xf32, #tpu.memory_space<vmem>>, vector<1x1x32xf32>
    %4 = vector.shape_cast %3 : vector<1x1x32xf32> to vector<1x32xf32>
    %cst = arith.constant dense<0.000000e+00> : vector<16x32xf32>
    %5 = tpu.matmul %0, %2, %cst {dimension_numbers = #tpu.dot_dimension_numbers<[1], [0], [0], [1], [0, 0, 1, 1], [], []>} : vector<16x32xf32>, vector<32x32xf32>, vector<16x32xf32> -> vector<16x32xf32>
    %6 = vector.broadcast %4 : vector<1x32xf32> to vector<16x32xf32>
    %7 = arith.addf %5, %6 : vector<16x32xf32>
    %cst_7 = arith.constant dense<0.000000e+00> : vector<16xf32>
    %8 = vector.multi_reduction <add>, %7, %cst_7 [1] : vector<16x32xf32> to vector<16xf32>
    %9 = vector.shape_cast %8 : vector<16xf32> to vector<16x1xf32>
    %cst_8 = arith.constant 3.200000e+01 : f32
    %10 = vector.broadcast %cst_8 : f32 to vector<16x1xf32>
    %11 = arith.divf %9, %10 : vector<16x1xf32>
    %12 = vector.broadcast %11 : vector<16x1xf32> to vector<16x32xf32>
    %13 = arith.subf %7, %12 : vector<16x32xf32>
    %14 = arith.mulf %13, %13 : vector<16x32xf32>
    %cst_9 = arith.constant dense<0.000000e+00> : vector<16xf32>
    %15 = vector.multi_reduction <add>, %14, %cst_9 [1] : vector<16x32xf32> to vector<16xf32>
    %16 = vector.shape_cast %15 : vector<16xf32> to vector<16x1xf32>
    %cst_10 = arith.constant 3.200000e+01 : f32
    %17 = vector.broadcast %cst_10 : f32 to vector<16x1xf32>
    %18 = arith.divf %16, %17 : vector<16x1xf32>
    %19 = vector.broadcast %11 : vector<16x1xf32> to vector<16x32xf32>
    %20 = arith.subf %7, %19 : vector<16x32xf32>
    %cst_11 = arith.constant 9.99999974E-6 : f32
    %21 = vector.broadcast %cst_11 : f32 to vector<16x1xf32>
    %22 = arith.addf %18, %21 : vector<16x1xf32>
    %23 = math.rsqrt %22 : vector<16x1xf32>
    %24 = vector.broadcast %23 : vector<16x1xf32> to vector<16x32xf32>
    %25 = arith.mulf %20, %24 : vector<16x32xf32>
    %cst_12 = arith.constant 0.000000e+00 : f32
    %26 = vector.broadcast %cst_12 : f32 to vector<16x32xf32>
    %27 = arith.maximumf %25, %26 : vector<16x32xf32>
    %c1 = arith.constant 1 : index
    %c0_13 = arith.constant 0 : index
    %c0_14 = arith.constant 0 : index
    %28 = vector.load %arg2[%c1, %c0_13, %c0_14] : memref<4x32x32xf32, #tpu.memory_space<vmem>>, vector<1x32x32xf32>
    %29 = vector.shape_cast %28 : vector<1x32x32xf32> to vector<32x32xf32>
    %c1_15 = arith.constant 1 : index
    %c0_16 = arith.constant 0 : index
    %c0_17 = arith.constant 0 : index
    %30 = vector.load %arg3[%c1_15, %c0_16, %c0_17] : memref<4x1x32xf32, #tpu.memory_space<vmem>>, vector<1x1x32xf32>
    %31 = vector.shape_cast %30 : vector<1x1x32xf32> to vector<1x32xf32>
    %cst_18 = arith.constant dense<0.000000e+00> : vector<16x32xf32>
    %32 = tpu.matmul %27, %29, %cst_18 {dimension_numbers = #tpu.dot_dimension_numbers<[1], [0], [0], [1], [0, 0, 1, 1], [], []>} : vector<16x32xf32>, vector<32x32xf32>, vector<16x32xf32> -> vector<16x32xf32>
    %33 = vector.broadcast %31 : vector<1x32xf32> to vector<16x32xf32>
    %34 = arith.addf %32, %33 : vector<16x32xf32>
    %cst_19 = arith.constant dense<0.000000e+00> : vector<16xf32>
    %35 = vector.multi_reduction <add>, %34, %cst_19 [1] : vector<16x32xf32> to vector<16xf32>
    %36 = vector.shape_cast %35 : vector<16xf32> to vector<16x1xf32>
    %cst_20 = arith.constant 3.200000e+01 : f32
    %37 = vector.broadcast %cst_20 : f32 to vector<16x1xf32>
    %38 = arith.divf %36, %37 : vector<16x1xf32>
    %39 = vector.broadcast %38 : vector<16x1xf32> to vector<16x32xf32>
    %40 = arith.subf %34, %39 : vector<16x32xf32>
    %41 = arith.mulf %40, %40 : vector<16x32xf32>
    %cst_21 = arith.constant dense<0.000000e+00> : vector<16xf32>
    %42 = vector.multi_reduction <add>, %41, %cst_21 [1] : vector<16x32xf32> to vector<16xf32>
    %43 = vector.shape_cast %42 : vector<16xf32> to vector<16x1xf32>
    %cst_22 = arith.constant 3.200000e+01 : f32
    %44 = vector.broadcast %cst_22 : f32 to vector<16x1xf32>
    %45 = arith.divf %43, %44 : vector<16x1xf32>
    %46 = vector.broadcast %38 : vector<16x1xf32> to vector<16x32xf32>
    %47 = arith.subf %34, %46 : vector<16x32xf32>
    %cst_23 = arith.constant 9.99999974E-6 : f32
    %48 = vector.broadcast %cst_23 : f32 to vector<16x1xf32>
    %49 = arith.addf %45, %48 : vector<16x1xf32>
    %50 = math.rsqrt %49 : vector<16x1xf32>
    %51 = vector.broadcast %50 : vector<16x1xf32> to vector<16x32xf32>
    %52 = arith.mulf %47, %51 : vector<16x32xf32>
    %cst_24 = arith.constant 0.000000e+00 : f32
    %53 = vector.broadcast %cst_24 : f32 to vector<16x32xf32>
    %54 = arith.maximumf %52, %53 : vector<16x32xf32>
    %c2 = arith.constant 2 : index
    %c0_25 = arith.constant 0 : index
    %c0_26 = arith.constant 0 : index
    %55 = vector.load %arg2[%c2, %c0_25, %c0_26] : memref<4x32x32xf32, #tpu.memory_space<vmem>>, vector<1x32x32xf32>
    %56 = vector.shape_cast %55 : vector<1x32x32xf32> to vector<32x32xf32>
    %c2_27 = arith.constant 2 : index
    %c0_28 = arith.constant 0 : index
    %c0_29 = arith.constant 0 : index
    %57 = vector.load %arg3[%c2_27, %c0_28, %c0_29] : memref<4x1x32xf32, #tpu.memory_space<vmem>>, vector<1x1x32xf32>
    %58 = vector.shape_cast %57 : vector<1x1x32xf32> to vector<1x32xf32>
    %cst_30 = arith.constant dense<0.000000e+00> : vector<16x32xf32>
    %59 = tpu.matmul %54, %56, %cst_30 {dimension_numbers = #tpu.dot_dimension_numbers<[1], [0], [0], [1], [0, 0, 1, 1], [], []>} : vector<16x32xf32>, vector<32x32xf32>, vector<16x32xf32> -> vector<16x32xf32>
    %60 = vector.broadcast %58 : vector<1x32xf32> to vector<16x32xf32>
    %61 = arith.addf %59, %60 : vector<16x32xf32>
    %cst_31 = arith.constant dense<0.000000e+00> : vector<16xf32>
    %62 = vector.multi_reduction <add>, %61, %cst_31 [1] : vector<16x32xf32> to vector<16xf32>
    %63 = vector.shape_cast %62 : vector<16xf32> to vector<16x1xf32>
    %cst_32 = arith.constant 3.200000e+01 : f32
    %64 = vector.broadcast %cst_32 : f32 to vector<16x1xf32>
    %65 = arith.divf %63, %64 : vector<16x1xf32>
    %66 = vector.broadcast %65 : vector<16x1xf32> to vector<16x32xf32>
    %67 = arith.subf %61, %66 : vector<16x32xf32>
    %68 = arith.mulf %67, %67 : vector<16x32xf32>
    %cst_33 = arith.constant dense<0.000000e+00> : vector<16xf32>
    %69 = vector.multi_reduction <add>, %68, %cst_33 [1] : vector<16x32xf32> to vector<16xf32>
    %70 = vector.shape_cast %69 : vector<16xf32> to vector<16x1xf32>
    %cst_34 = arith.constant 3.200000e+01 : f32
    %71 = vector.broadcast %cst_34 : f32 to vector<16x1xf32>
    %72 = arith.divf %70, %71 : vector<16x1xf32>
    %73 = vector.broadcast %65 : vector<16x1xf32> to vector<16x32xf32>
    %74 = arith.subf %61, %73 : vector<16x32xf32>
    %cst_35 = arith.constant 9.99999974E-6 : f32
    %75 = vector.broadcast %cst_35 : f32 to vector<16x1xf32>
    %76 = arith.addf %72, %75 : vector<16x1xf32>
    %77 = math.rsqrt %76 : vector<16x1xf32>
    %78 = vector.broadcast %77 : vector<16x1xf32> to vector<16x32xf32>
    %79 = arith.mulf %74, %78 : vector<16x32xf32>
    %cst_36 = arith.constant 0.000000e+00 : f32
    %80 = vector.broadcast %cst_36 : f32 to vector<16x32xf32>
    %81 = arith.maximumf %79, %80 : vector<16x32xf32>
    %c3 = arith.constant 3 : index
    %c0_37 = arith.constant 0 : index
    %c0_38 = arith.constant 0 : index
    %82 = vector.load %arg2[%c3, %c0_37, %c0_38] : memref<4x32x32xf32, #tpu.memory_space<vmem>>, vector<1x32x32xf32>
    %83 = vector.shape_cast %82 : vector<1x32x32xf32> to vector<32x32xf32>
    %c3_39 = arith.constant 3 : index
    %c0_40 = arith.constant 0 : index
    %c0_41 = arith.constant 0 : index
    %84 = vector.load %arg3[%c3_39, %c0_40, %c0_41] : memref<4x1x32xf32, #tpu.memory_space<vmem>>, vector<1x1x32xf32>
    %85 = vector.shape_cast %84 : vector<1x1x32xf32> to vector<1x32xf32>
    %cst_42 = arith.constant dense<0.000000e+00> : vector<16x32xf32>
    %86 = tpu.matmul %81, %83, %cst_42 {dimension_numbers = #tpu.dot_dimension_numbers<[1], [0], [0], [1], [0, 0, 1, 1], [], []>} : vector<16x32xf32>, vector<32x32xf32>, vector<16x32xf32> -> vector<16x32xf32>
    %87 = vector.broadcast %85 : vector<1x32xf32> to vector<16x32xf32>
    %88 = arith.addf %86, %87 : vector<16x32xf32>
    %cst_43 = arith.constant dense<0.000000e+00> : vector<16xf32>
    %89 = vector.multi_reduction <add>, %88, %cst_43 [1] : vector<16x32xf32> to vector<16xf32>
    %90 = vector.shape_cast %89 : vector<16xf32> to vector<16x1xf32>
    %cst_44 = arith.constant 3.200000e+01 : f32
    %91 = vector.broadcast %cst_44 : f32 to vector<16x1xf32>
    %92 = arith.divf %90, %91 : vector<16x1xf32>
    %93 = vector.broadcast %92 : vector<16x1xf32> to vector<16x32xf32>
    %94 = arith.subf %88, %93 : vector<16x32xf32>
    %95 = arith.mulf %94, %94 : vector<16x32xf32>
    %cst_45 = arith.constant dense<0.000000e+00> : vector<16xf32>
    %96 = vector.multi_reduction <add>, %95, %cst_45 [1] : vector<16x32xf32> to vector<16xf32>
    %97 = vector.shape_cast %96 : vector<16xf32> to vector<16x1xf32>
    %cst_46 = arith.constant 3.200000e+01 : f32
    %98 = vector.broadcast %cst_46 : f32 to vector<16x1xf32>
    %99 = arith.divf %97, %98 : vector<16x1xf32>
    %100 = vector.broadcast %92 : vector<16x1xf32> to vector<16x32xf32>
    %101 = arith.subf %88, %100 : vector<16x32xf32>
    %cst_47 = arith.constant 9.99999974E-6 : f32
    %102 = vector.broadcast %cst_47 : f32 to vector<16x1xf32>
    %103 = arith.addf %99, %102 : vector<16x1xf32>
    %104 = math.rsqrt %103 : vector<16x1xf32>
    %105 = vector.broadcast %104 : vector<16x1xf32> to vector<16x32xf32>
    %106 = arith.mulf %101, %105 : vector<16x32xf32>
    %cst_48 = arith.constant 0.000000e+00 : f32
    %107 = vector.broadcast %cst_48 : f32 to vector<16x32xf32>
    %108 = arith.maximumf %106, %107 : vector<16x32xf32>
    %c0_49 = arith.constant 0 : index
    %c0_50 = arith.constant 0 : index
    %109 = vector.load %arg4[%c0_49, %c0_50] : memref<16x32xf32, #tpu.memory_space<vmem>>, vector<16x32xf32>
    tpu.vector_store %arg4[%c0_49, %c0_50], %108 {strides = array<i32>} : memref<16x32xf32, #tpu.memory_space<vmem>>, vector<16x32xf32>,
    return
  }
  func.func @transform_0(%arg0: i32) -> (i32, i32) {
    %c0_i32 = arith.constant 0 : i32
    %c0_i32_0 = arith.constant 0 : i32
    return %arg0, %c0_i32 : i32, i32
  }
  func.func @transform_1(%arg0: i32) -> (i32, i32, i32) {
    %c0_i32 = arith.constant 0 : i32
    %c0_i32_0 = arith.constant 0 : i32
    %c0_i32_1 = arith.constant 0 : i32
    %c0_i32_2 = arith.constant 0 : i32
    return %c0_i32, %c0_i32_0, %c0_i32_1 : i32, i32, i32
  }
  func.func @transform_2(%arg0: i32) -> (i32, i32, i32) {
    %c0_i32 = arith.constant 0 : i32
    %c0_i32_0 = arith.constant 0 : i32
    %c0_i32_1 = arith.constant 0 : i32
    %c0_i32_2 = arith.constant 0 : i32
    return %c0_i32, %c0_i32_0, %c0_i32_1 : i32, i32, i32
  }
  func.func @transform_3(%arg0: i32) -> (i32, i32) {
    %c0_i32 = arith.constant 0 : i32
    %c0_i32_0 = arith.constant 0 : i32
    return %arg0, %c0_i32 : i32, i32
  }
}

</mosaic_0001>

<bundles_post_ra>
// kernel: seqnn_forward.1
= control target key start
LH: loop header
LB: loop body
LE: loop exit
PB: predicated region body
PF: predicated region fallthrough
CT: control target
= control target key end

     0   :  { %8 = vsyncpa [#allocation3], 0  ;;  %s914_s0 = inlined_call_operand.hbm [shape: f32[16,32], index: 0, kind: input, shape index: {}]   ;;  %s915_s1 = inlined_call_operand.hbm [shape: f32[4,32,32], index: 1, kind: input, shape index: {}]   ;;  %s916_s2 = inlined_call_operand.hbm [shape: f32[4,1,32], index: 2, kind: input, shape index: {}]   ;;  %s917_s3 = inlined_call_operand.hbm [shape: f32[16,32], index: 3, kind: output, shape index: {}]  }
   0x1   :  { %9 = vsyncpa [#allocation6], 0 }
   0x2   :  { %10 = vsyncpa [#allocation4], 0  ;;  %s796_s12 = smov [#allocation5]   ;;  %s797_s14 = smov [#allocation2]  }
   0x3   :  { %s28_s13 = sshll.u32 %s796_s12, 4  ;;  %s16_s15 = sshll.u32 %s797_s14, 4  ;;  %s29_s13 = int_to_ptr.vmem [resolvable:$true] %s28_s13  ;;  %s824_s15 = int_to_ptr.vmem [resolvable:$true] %s16_s15 }
   0x4   :  { %s702_s18 = scalar_lea.hbm %s915_s1, 2048 }
   0x5   :  { %p703_p0 = scmp.ne.s32.totalorder %s915_s1, %s702_s18  ;;  %p706_p1 = scmp.lt.u32.totalorder %s702_s18, %s915_s1 }
   0x7   :  { %p708_p2 = pnand %p706_p1, %p703_p0 }
   0x9   :  { %711 = shalt.err (!%p708_p2)
}
   0xa   :  { %s712_s23 = scalar_lea.vmem %s29_s13, 2048  ;;  %p717_p4 = scmp.lt.s32.totalorder %s29_s13, %s29_s13 }
   0xb   :  { %p713_p3 = scmp.ne.s32.totalorder %s29_s13, %s712_s23  ;;  %p718_p5 = scmp.lt.s32.totalorder %s712_s23, %s712_s23 }
   0xd   :  { %p719_p6 = por %p718_p5, %p717_p4 }
   0xf   :  { %p720_p7 = pnand %p719_p6, %p713_p3 }
  0x11   :  { %723 = shalt.err (!%p720_p7)
}
  0x12   :  { %s798_s24 = smov 128   ;;  %s799_s25 = smov 8  }
  0x13   :  { %34 = dma.hbm_to_vmem [thread:$0]  %s915_s1, 2048, %s29_s13, [#allocation6], %s798_s24, %s798_s24, %s799_s25  }
  0x14   :  { %s724_s30 = scalar_lea.hbm %s914_s0, 256 }
  0x15   :  { %p725_p8 = scmp.ne.s32.totalorder %s914_s0, %s724_s30  ;;  %p728_p9 = scmp.lt.u32.totalorder %s724_s30, %s914_s0 }
  0x17   :  { %p730_p10 = pnand %p728_p9, %p725_p8 }
  0x19   :  { %733 = shalt.err (!%p730_p10)
}
  0x1a   :  { %s734_s8 = scalar_lea.vmem %s824_s15, 256  ;;  %p739_p12 = scmp.lt.s32.totalorder %s824_s15, %s824_s15 }
  0x1b   :  { %p735_p11 = scmp.ne.s32.totalorder %s824_s15, %s734_s8  ;;  %p740_p13 = scmp.lt.s32.totalorder %s734_s8, %s734_s8 }
  0x1d   :  { %p741_p0 = por %p740_p13, %p739_p12 }
  0x1f   :  { %p742_p1 = pnand %p741_p0, %p735_p11 }
  0x21   :  { %745 = shalt.err (!%p742_p1)
}
  0x22   :  { %22 = dma.hbm_to_vmem [thread:$0]  %s914_s0, 256, %s824_s15, [#allocation3], %s798_s24, %s798_s24, %s799_s25  }
  0x23   :  { %s800_s10 = smov [#allocation7]   ;;  %s746_s14 = scalar_lea.hbm %s916_s2, 64 }
  0x24   :  { %s40_s11 = sshll.u32 %s800_s10, 4  ;;  %p747_p2 = scmp.ne.s32.totalorder %s916_s2, %s746_s14  ;;  %s41_s11 = int_to_ptr.vmem [resolvable:$true] %s40_s11 }
  0x25   :  { %p750_p3 = scmp.lt.u32.totalorder %s746_s14, %s916_s2 }
  0x27   :  { %p752_p4 = pnand %p750_p3, %p747_p2 }
  0x29   :  { %755 = shalt.err (!%p752_p4)
}
  0x2a   :  { %s756_s20 = scalar_lea.vmem %s41_s11, 64  ;;  %p761_p6 = scmp.lt.s32.totalorder %s41_s11, %s41_s11 }
  0x2b   :  { %p757_p5 = scmp.ne.s32.totalorder %s41_s11, %s756_s20  ;;  %p762_p7 = scmp.lt.s32.totalorder %s756_s20, %s756_s20 }
  0x2d   :  { %p763_p8 = por %p762_p7, %p761_p6 }
  0x2f   :  { %p764_p9 = pnand %p763_p8, %p757_p5 }
  0x31   :  { %767 = shalt.err (!%p764_p9)
}
  0x32   :  { %s801_s0 = smov 16   ;;  %s802_s15 = smov 1  }
  0x33   :  { %46 = dma.hbm_to_vmem [thread:$0]  %s916_s2, 64, %s41_s11, [#allocation6], %s801_s0, %s801_s0, %s802_s15  }
  0x34   :  { %790 = dma.done.wait [#allocation3], 256  }
  0x35   :  { %791 = vsyncadd [#allocation3], 4294967040 }
  0x36   :  { %792 = dma.done.wait [#allocation6], 2112  }
  0x37   :  { %793 = vsyncadd [#allocation6], 4294965184  ;;  %vm69_vm0 = vcmask 261120   ;;  %v58_v0 = vld [vmem:[#allocation5] sm:$0xff]  ;;  %v59_v1 = vld [vmem:[#allocation5 + $0x8] sm:$0xff]  ;;  %s803_s2 = smov [#allocation8]  }
  0x38   :  { %v60_v2 = vld [vmem:[#allocation5 + $0x10] sm:$0xff]  ;;  %v646_v3 = vpack.c.bf16 %v59_v1, %v58_v0  ;;  %v61_v4 = vld [vmem:[#allocation5 + $0x18] sm:$0xff]  ;;  %v566_v8 = vld [vmem:[#allocation7] ss:$0 sm:$0xff]  ;;  %s553_s23 = sshll.u32 %s803_s2, 4  ;;  %s554_s23 = int_to_ptr.vmem [resolvable:$true] %s553_s23 }
  0x39   :  { %v56_v5 = vld [vmem:[#allocation2] sm:$0xff]  ;;  %v650_v6 = vpack.c.bf16 %v61_v4, %v60_v2  ;;  %v57_v7 = vld [vmem:[#allocation2 + $0x8] sm:$0xff]  ;;  %v181_v25 = vld [vmem:[#allocation5 + $0x20] sm:$0xff]  ;;  %s768_s26 = scalar_lea.vmem %s554_s23, 256  ;;  %p773_p11 = scmp.lt.s32.totalorder %s554_s23, %s554_s23 }
  0x3a   :  { %610 = vmatprep.mubr.msk.f32.mxu0 %vm69_vm0, %v56_v5  ;;  %647 = vmatprep.subr.bf16.mxu0 %v646_v3  ;;  %v182_v26 = vld [vmem:[#allocation5 + $0x28] sm:$0xff]  ;;  %v183_v27 = vld [vmem:[#allocation5 + $0x30] sm:$0xff]  ;;  %v184_v29 = vld [vmem:[#allocation5 + $0x38] sm:$0xff]  ;;  %p769_p10 = scmp.ne.s32.totalorder %s554_s23, %s768_s26  ;;  %p774_p12 = scmp.lt.s32.totalorder %s768_s26, %s768_s26 }
  0x3b   :  { %649 = vmatpush3.bf16.msra.mxu0 %v646_v3  ;;  %v654_v28 = vpack.c.bf16 %v182_v26, %v181_v25  ;;  %v658_v30 = vpack.c.bf16 %v184_v29, %v183_v27  ;;  %v569_v43 = vld [vmem:[#allocation7 + $0x1] ss:$0 sm:$0xff]  ;;  %v304_v61 = vld [vmem:[#allocation5 + $0x48] sm:$0xff]  ;;  %v305_v62 = vld [vmem:[#allocation5 + $0x50] sm:$0xff] }
  0x3c   :  { %651 = vmatprep.subr.bf16.mxu0 %v650_v6  ;;  %v303_v60 = vld [vmem:[#allocation5 + $0x40] sm:$0xff]  ;;  %v306_v0 = vld [vmem:[#allocation5 + $0x58] sm:$0xff]  ;;  %p775_p13 = por %p774_p12, %p773_p11 }
  0x3d   :  { %655 = vmatprep.subr.bf16.mxu1 %v654_v28  ;;  %v662_v63 = vpack.c.bf16 %v304_v61, %v303_v60  ;;  %v666_v1 = vpack.c.bf16 %v306_v0, %v305_v62 }
  0x3e   :  { %657 = vmatpush3.bf16.msra.mxu1 %v654_v28  ;;  %p776_p0 = pnand %p775_p13, %p769_p10 }
  0x3f   :  { %653 = vmatpush3.bf16.msra.mxu0 %v650_v6  ;;  %659 = vmatprep.subr.bf16.mxu1 %v658_v30 }
  0x40   :  { %663 = vmatprep.subr.bf16.mxu0 %v662_v63 }
  0x42   :  { %611 = vmatmul.mubr.msk.f32.vlgmr.msra.gmra.mrb[0].mxu0 %vm69_vm0, %v57_v7  ;;  %661 = vmatpush3.bf16.msra.mxu1 %v658_v30 }
  0x43   :  { %665 = vmatpush3.bf16.msra.mxu0 %v662_v63 }
  0x44   :  { %667 = vmatprep.subr.bf16.mxu0 %v666_v1 }
  0x47   :  { %669 = vmatpush3.bf16.msra.mxu0 %v666_v1 }
 0x115   :  { %v612_v9 = vpop.f32.mrb[0].mxu0 }
 0x116   :  { %v142_v10 = vpop.f32.mrb[1].mxu0  ;;  %v148_v12 = vadd.f32 %v612_v9, %v566_v8 }
 0x117   :  { %v143_v11 = vadd.f32 %v566_v8, %v142_v10 }
 0x118   :  { %v154_v14 = vsel %vm69_vm0, %v148_v12, 0.0 }
 0x119   :  { %v151_v13 = vsel %vm69_vm0, %v143_v11, 0.0 }
 0x11a   :  { %152 = vadd.xlane.f32.xlu0 %v151_v13 }
 0x11e   :  { %155 = vadd.xlane.f32.xlu0 %v154_v14  ;;  %v572_v14 = vld [vmem:[#allocation7 + $0x2] ss:$0 sm:$0xff] }
 0x1a7   :  { %v153_v15 = vpop.xlane.xlu0 %152 }
 0x1a8   :  { %v158_v16 = vmul.f32 0.03125, %v153_v15 }
 0x1aa   :  { %v160_v17 = vsub.f32 %v143_v11, %v158_v16 }
 0x1ab   :  { %v156_v18 = vpop.xlane.xlu0 %155 }
 0x1ac   :  { %v159_v19 = vmul.f32 0.03125, %v156_v18  ;;  %v162_v20 = vmul.f32 %v160_v17, %v160_v17 }
 0x1ae   :  { %v161_v21 = vsub.f32 %v148_v12, %v159_v19  ;;  %v164_v22 = vsel %vm69_vm0, %v162_v20, 0.0 }
 0x1af   :  { %165 = vadd.xlane.f32.xlu1 %v164_v22 }
 0x1b0   :  { %v163_v23 = vmul.f32 %v161_v21, %v161_v21 }
 0x1b2   :  { %v167_v24 = vsel %vm69_vm0, %v163_v23, 0.0 }
 0x1b3   :  { %168 = vadd.xlane.f32.xlu1 %v167_v24 }
 0x23c   :  { %v166_v31 = vpop.xlane.xlu1 %165 }
 0x23d   :  { %v170_v32 = vmul.f32 0.03125, %v166_v31  ;;  %v425_v31 = vld [vmem:[#allocation5 + $0x60] sm:$0xff] }
 0x23f   :  { %v172_v33 = vadd.f32 1e-05, %v170_v32  ;;  %v426_v32 = vld [vmem:[#allocation5 + $0x68] sm:$0xff] }
 0x240   :  { %v169_v34 = vpop.xlane.xlu1 %168 }
 0x241   :  { %686 = vrsqrt.f32 %v172_v33  ;;  %v171_v35 = vmul.f32 0.03125, %v169_v34  ;;  %v427_v33 = vld [vmem:[#allocation5 + $0x70] sm:$0xff]  ;;  %v670_v34 = vpack.c.bf16 %v426_v32, %v425_v31 }
 0x243   :  { %v173_v36 = vadd.f32 1e-05, %v171_v35  ;;  %v428_v35 = vld [vmem:[#allocation5 + $0x78] sm:$0xff]  ;;  %671 = vmatprep.subr.bf16.mxu1 %v670_v34 }
 0x245   :  { %688 = vrsqrt.f32 %v173_v36  ;;  %v674_v36 = vpack.c.bf16 %v428_v35, %v427_v33 }
 0x24b   :  { %v687_v37 = vpop.eup %686 }
 0x24c   :  { %v176_v38 = vmul.f32 %v687_v37, %v160_v17 }
 0x24e   :  { %v178_v39 = vmax.f32 %v176_v38, 0.0 }
 0x24f   :  { %v689_v40 = vpop.eup %688 }
 0x250   :  { %621 = vmatprep.mubr.msk.f32.mxu1 %vm69_vm0, %v178_v39  ;;  %v177_v41 = vmul.f32 %v689_v40, %v161_v21 }
 0x252   :  { %v179_v42 = vmax.f32 %v177_v41, 0.0 }
 0x254   :  { %622 = vmatmul.mubr.msk.f32.vlgmr.msra.gmra.mrb[0].mxu1 %vm69_vm0, %v179_v42 }
 0x255   :  { %673 = vmatpush3.bf16.msra.mxu1 %v670_v34 }
 0x256   :  { %675 = vmatprep.subr.bf16.mxu1 %v674_v36 }
 0x259   :  { %677 = vmatpush3.bf16.msra.mxu1 %v674_v36 }
 0x327   :  { %v623_v44 = vpop.f32.mrb[0].mxu1 }
 0x328   :  { %v271_v45 = vadd.f32 %v623_v44, %v569_v43  ;;  %v265_v46 = vpop.f32.mrb[1].mxu1 }
 0x329   :  { %v266_v47 = vadd.f32 %v569_v43, %v265_v46 }
 0x32a   :  { %v277_v48 = vsel %vm69_vm0, %v271_v45, 0.0 }
 0x32b   :  { %278 = vadd.xlane.f32.xlu1 %v277_v48  ;;  %v274_v49 = vsel %vm69_vm0, %v266_v47, 0.0 }
 0x32c   :  { %275 = vadd.xlane.f32.xlu0 %v274_v49  ;;  %v575_v49 = vld [vmem:[#allocation7 + $0x3] ss:$0 sm:$0xff] }
 0x3b8   :  { %v279_v50 = vpop.xlane.xlu1 %278 }
 0x3b9   :  { %v281_v51 = vmul.f32 0.03125, %v279_v50  ;;  %v276_v52 = vpop.xlane.xlu0 %275 }
 0x3ba   :  { %v280_v53 = vmul.f32 0.03125, %v276_v52 }
 0x3bb   :  { %v283_v54 = vsub.f32 %v271_v45, %v281_v51 }
 0x3bc   :  { %v282_v55 = vsub.f32 %v266_v47, %v280_v53 }
 0x3bd   :  { %v285_v56 = vmul.f32 %v283_v54, %v283_v54 }
 0x3be   :  { %v284_v57 = vmul.f32 %v282_v55, %v282_v55 }
 0x3bf   :  { %v289_v58 = vsel %vm69_vm0, %v285_v56, 0.0 }
 0x3c0   :  { %290 = vadd.xlane.f32.xlu1 %v289_v58  ;;  %v286_v59 = vsel %vm69_vm0, %v284_v57, 0.0 }
 0x3c1   :  { %287 = vadd.xlane.f32.xlu0 %v286_v59 }
 0x44d   :  { %v291_v2 = vpop.xlane.xlu1 %290 }
 0x44e   :  { %v293_v3 = vmul.f32 0.03125, %v291_v2  ;;  %v288_v4 = vpop.xlane.xlu0 %287 }
 0x44f   :  { %v292_v5 = vmul.f32 0.03125, %v288_v4 }
 0x450   :  { %v295_v6 = vadd.f32 1e-05, %v293_v3 }
 0x451   :  { %v294_v7 = vadd.f32 1e-05, %v292_v5 }
 0x452   :  { %690 = vrsqrt.f32 %v295_v6 }
 0x453   :  { %692 = vrsqrt.f32 %v294_v7 }
 0x45c   :  { %v691_v8 = vpop.eup %690 }
 0x45d   :  { %v693_v9 = vpop.eup %692  ;;  %v299_v10 = vmul.f32 %v691_v8, %v283_v54 }
 0x45e   :  { %v298_v11 = vmul.f32 %v693_v9, %v282_v55 }
 0x45f   :  { %v301_v13 = vmax.f32 %v299_v10, 0.0 }
 0x460   :  { %v300_v12 = vmax.f32 %v298_v11, 0.0 }
 0x462   :  { %632 = vmatprep.mubr.msk.f32.mxu0 %vm69_vm0, %v300_v12 }
 0x463   :  { %633 = vmatmul.mubr.msk.f32.vlgmr.msra.gmra.mrb[2].mxu0 %vm69_vm0, %v301_v13 }
 0x536   :  { %v634_v15 = vpop.f32.mrb[2].mxu0 }
 0x537   :  { %v393_v16 = vadd.f32 %v634_v15, %v572_v14  ;;  %v387_v17 = vpop.f32.mrb[3].mxu0 }
 0x538   :  { %v388_v18 = vadd.f32 %v572_v14, %v387_v17 }
 0x539   :  { %v399_v19 = vsel %vm69_vm0, %v393_v16, 0.0 }
 0x53a   :  { %400 = vadd.xlane.f32.xlu1 %v399_v19  ;;  %v396_v20 = vsel %vm69_vm0, %v388_v18, 0.0 }
 0x53b   :  { %397 = vadd.xlane.f32.xlu0 %v396_v20 }
 0x5c7   :  { %v401_v21 = vpop.xlane.xlu1 %400 }
 0x5c8   :  { %v403_v22 = vmul.f32 0.03125, %v401_v21  ;;  %v398_v23 = vpop.xlane.xlu0 %397 }
 0x5c9   :  { %v402_v24 = vmul.f32 0.03125, %v398_v23 }
 0x5ca   :  { %v405_v25 = vsub.f32 %v393_v16, %v403_v22 }
 0x5cb   :  { %v404_v26 = vsub.f32 %v388_v18, %v402_v24 }
 0x5cc   :  { %v407_v27 = vmul.f32 %v405_v25, %v405_v25 }
 0x5cd   :  { %v406_v28 = vmul.f32 %v404_v26, %v404_v26 }
 0x5ce   :  { %v411_v29 = vsel %vm69_vm0, %v407_v27, 0.0 }
 0x5cf   :  { %412 = vadd.xlane.f32.xlu1 %v411_v29  ;;  %v408_v30 = vsel %vm69_vm0, %v406_v28, 0.0 }
 0x5d0   :  { %409 = vadd.xlane.f32.xlu0 %v408_v30 }
 0x65c   :  { %v413_v37 = vpop.xlane.xlu1 %412 }
 0x65d   :  { %v415_v38 = vmul.f32 0.03125, %v413_v37  ;;  %v410_v39 = vpop.xlane.xlu0 %409 }
 0x65e   :  { %v414_v40 = vmul.f32 0.03125, %v410_v39 }
 0x65f   :  { %v417_v41 = vadd.f32 1e-05, %v415_v38 }
 0x660   :  { %v416_v42 = vadd.f32 1e-05, %v414_v40 }
 0x661   :  { %694 = vrsqrt.f32 %v417_v41 }
 0x662   :  { %696 = vrsqrt.f32 %v416_v42 }
 0x66b   :  { %v695_v43 = vpop.eup %694 }
 0x66c   :  { %v697_v44 = vpop.eup %696  ;;  %v421_v45 = vmul.f32 %v695_v43, %v405_v25 }
 0x66d   :  { %v420_v46 = vmul.f32 %v697_v44, %v404_v26 }
 0x66e   :  { %v423_v48 = vmax.f32 %v421_v45, 0.0 }
 0x66f   :  { %v422_v47 = vmax.f32 %v420_v46, 0.0 }
 0x671   :  { %643 = vmatprep.mubr.msk.f32.mxu1 %vm69_vm0, %v422_v47 }
 0x672   :  { %644 = vmatmul.mubr.msk.f32.vlgmr.msra.gmra.mrb[2].mxu1 %vm69_vm0, %v423_v48 }
 0x745   :  { %v645_v50 = vpop.f32.mrb[2].mxu1 }
 0x746   :  { %v515_v51 = vadd.f32 %v645_v50, %v575_v49  ;;  %v509_v52 = vpop.f32.mrb[3].mxu1 }
 0x747   :  { %v510_v53 = vadd.f32 %v575_v49, %v509_v52 }
 0x748   :  { %v521_v54 = vsel %vm69_vm0, %v515_v51, 0.0 }
 0x749   :  { %522 = vadd.xlane.f32.xlu1 %v521_v54  ;;  %v518_v55 = vsel %vm69_vm0, %v510_v53, 0.0 }
 0x74a   :  { %519 = vadd.xlane.f32.xlu0 %v518_v55 }
 0x7d6   :  { %v523_v56 = vpop.xlane.xlu1 %522 }
 0x7d7   :  { %v525_v57 = vmul.f32 0.03125, %v523_v56  ;;  %v520_v58 = vpop.xlane.xlu0 %519 }
 0x7d8   :  { %v524_v59 = vmul.f32 0.03125, %v520_v58 }
 0x7d9   :  { %v527_v60 = vsub.f32 %v515_v51, %v525_v57 }
 0x7da   :  { %v526_v61 = vsub.f32 %v510_v53, %v524_v59 }
 0x7db   :  { %v529_v62 = vmul.f32 %v527_v60, %v527_v60 }
 0x7dc   :  { %v528_v63 = vmul.f32 %v526_v61, %v526_v61 }
 0x7dd   :  { %v533_v0 = vsel %vm69_vm0, %v529_v62, 0.0 }
 0x7de   :  { %534 = vadd.xlane.f32.xlu1 %v533_v0  ;;  %v530_v1 = vsel %vm69_vm0, %v528_v63, 0.0 }
 0x7df   :  { %531 = vadd.xlane.f32.xlu0 %v530_v1 }
 0x86b   :  { %v535_v2 = vpop.xlane.xlu1 %534 }
 0x86c   :  { %v537_v3 = vmul.f32 0.03125, %v535_v2  ;;  %v532_v4 = vpop.xlane.xlu0 %531 }
 0x86d   :  { %v536_v5 = vmul.f32 0.03125, %v532_v4 }
 0x86e   :  { %v539_v6 = vadd.f32 1e-05, %v537_v3 }
 0x86f   :  { %v538_v7 = vadd.f32 1e-05, %v536_v5 }
 0x870   :  { %698 = vrsqrt.f32 %v539_v6 }
 0x871   :  { %700 = vrsqrt.f32 %v538_v7 }
 0x87a   :  { %v699_v8 = vpop.eup %698 }
 0x87b   :  { %v701_v9 = vpop.eup %700  ;;  %v543_v10 = vmul.f32 %v699_v8, %v527_v60 }
 0x87c   :  { %v542_v11 = vmul.f32 %v701_v9, %v526_v61 }
 0x87d   :  { %v545_v12 = vmax.f32 %v543_v10, 0.0 }
 0x87e   :  { %v544_v13 = vmax.f32 %v542_v11, 0.0 }
 0x87f   :  { %547 = vst.msk [vmem:[#allocation8 + $0x8] sm:$0xff] %vm69_vm0, %v545_v12 }
 0x880   :  { %546 = vst.msk [vmem:[#allocation8] sm:$0xff] %vm69_vm0, %v544_v13 }
 0x881   :  { %779 = shalt.err (!%p776_p0)
}
 0x882   :  { %s780_s29 = scalar_lea.hbm %s917_s3, 256 }
 0x883   :  { %p781_p1 = scmp.ne.s32.totalorder %s917_s3, %s780_s29  ;;  %p784_p2 = scmp.lt.u32.totalorder %s780_s29, %s917_s3 }
 0x885   :  { %p786_p3 = pnand %p784_p2, %p781_p1 }
 0x887   :  { %789 = shalt.err (!%p786_p3)
}
 0x888   :  { %559 = dma.vmem_to_hbm [thread:$0]  %s554_s23, 256, %s917_s3, [#allocation4], %s798_s24, %s798_s24, %s799_s25  }
 0x889   :  { %794 = dma.done.wait [#allocation4], 256  }
 0x88a   :  { %795 = vsyncadd [#allocation4], 4294967040 }
 0x88b   :  { %563 = vsyncpa [#allocation3], 1 }
 0x88c   :  { %564 = vsyncpa [#allocation6], 1 }
 0x88d   :  { %565 = vsyncpa [#allocation4], 1 }

</bundles_post_ra>
